<compile_context>
chip_gen: v5e
topology: v5e:2x2
jax: 0.10.0
libtpu: 0.0.40
codegen_flags: <defaults>
</compile_context>

<pallas_src>
import jax
import jax.numpy as jnp
from jax.experimental import pallas as pl
from jax.experimental.pallas import tpu as pltpu


def _round_up(x, m):
    return ((x + m - 1) // m) * m


def _choose_tm(M, max_tile_rows):
    """Pick a row-tile size TM.

    Returns (TM, needs_pad).  Preference order:
      1. TM multiple of 8 that divides M exactly (no input padding), with
         num_tiles >= 2 so v7x can use both TensorCores, as large as possible
         (<= max_tile_rows) to amortize per-grid-step overhead.
      2. A single full-extent block (TM == M) when M is small.
      3. Padded tiling (rare: large M not divisible by 8, or only degenerate
         tiny divisors exist).
    """
    max_tile_rows = max(8, (max_tile_rows // 8) * 8)
    if M % 8 == 0 and M >= 16:
        upper = max(8, (min(max_tile_rows, M // 2) // 8) * 8)
        best = None
        for t in range(upper, 7, -8):
            if M % t == 0:
                best = t
                break
        # Accept the divisor tile only if it isn't degenerately small
        # (avoids thousands of tiny grid steps for awkward M).
        if best is not None and (best >= upper // 4 or M // best <= 64):
            return best, False
    if M <= max_tile_rows:
        return M, False          # single full-extent block (legal even if M % 8 != 0)
    return max_tile_rows, True   # rare fallback: pad inputs/outputs


# ----------------------------------------------------------------------------
# Pallas kernel: one row-tile of the full MultiModal_SE forward.
# ----------------------------------------------------------------------------
def mmse_kernel(
    s_ref, e_ref,                 # (TM, Ds), (TM, De)
    ws_ref, bs_ref,               # S_Encoder    (Ds, H), (1, H)
    we_ref, be_ref,               # E_Encoder    (De, H), (1, H)
    wfs_ref, wfe_ref, bf_ref,     # Fusion_layer split: (H, H), (H, H), (1, H)
    wsd_ref, bsd_ref,             # S_Decoder    (H, Ds), (1, Ds)
    wed_ref, bed_ref,             # E_Decoder    (H, De), (1, De)
    hs_ref, he_ref, hf_ref,       # (TM, H) x3
    y_ref, eo_ref,                # (TM, Ds), (TM, De)
):
    s = s_ref[...]
    e = e_ref[...]

    # --- encoders: Linear + ReLU ---
    h_s = jnp.maximum(
        jnp.dot(s, ws_ref[...], preferred_element_type=jnp.float32) + bs_ref[...], 0.0)
    h_e = jnp.maximum(
        jnp.dot(e, we_ref[...], preferred_element_type=jnp.float32) + be_ref[...], 0.0)

    # --- fusion: concat along features == two accumulating matmuls on the
    #     split weight (no cross-lane concat needed) ---
    h_f = jnp.maximum(
        jnp.dot(h_s, wfs_ref[...], preferred_element_type=jnp.float32)
        + jnp.dot(h_e, wfe_ref[...], preferred_element_type=jnp.float32)
        + bf_ref[...], 0.0)

    # --- direct writes of all five module outputs ---
    hs_ref[...] = h_s
    he_ref[...] = h_e
    hf_ref[...] = h_f
    y_ref[...] = jnp.dot(h_f, wsd_ref[...], preferred_element_type=jnp.float32) + bsd_ref[...]
    eo_ref[...] = jnp.dot(h_f, wed_ref[...], preferred_element_type=jnp.float32) + bed_ref[...]


def multimodal_se_forward(s, e, params, *, max_tile_rows=2048):
    """s: (N, Seq, 257), e: (N, Seq, 124). Returns (h_s, h_e, h_f, y_, e_)."""
    N, Seq, Ds = s.shape
    _, _, De = e.shape
    H = params["ws"].shape[1]
    M = N * Seq

    s2d = s.reshape(M, Ds)   # leading-dim merge: metadata only
    e2d = e.reshape(M, De)

    TM, needs_pad = _choose_tm(M, max_tile_rows)
    if needs_pad:
        # Rare fallback (extra input pass); the main path never hits this.
        M_pad = _round_up(M, TM)
        s2d = jnp.pad(s2d, ((0, M_pad - M), (0, 0)))
        e2d = jnp.pad(e2d, ((0, M_pad - M), (0, 0)))
    else:
        M_pad = M
    num_tiles = M_pad // TM

    # --- host-side (tiny, one-time) weight split for the concat fusion ---
    wf = params["wf"]
    wf_s = wf[:H, :]
    wf_e = wf[H:, :]

    def row(feat):
        return pl.BlockSpec((TM, feat), lambda i: (i, 0))

    def resident(arr):
        # same block every grid step -> stays VMEM-resident (no re-DMA)
        return pl.BlockSpec(arr.shape, lambda i: (0, 0))

    out_shapes = (
        jax.ShapeDtypeStruct((M_pad, H), jnp.float32),    # h_s
        jax.ShapeDtypeStruct((M_pad, H), jnp.float32),    # h_e
        jax.ShapeDtypeStruct((M_pad, H), jnp.float32),    # h_f
        jax.ShapeDtypeStruct((M_pad, Ds), jnp.float32),   # y_
        jax.ShapeDtypeStruct((M_pad, De), jnp.float32),   # e_
    )
    out_specs = (row(H), row(H), row(H), row(Ds), row(De))

    # Advisory cost hint for XLA scheduling around this memory-bound call.
    weight_elems = (Ds * H + De * H + 2 * H * H + H * Ds + H * De) + (5 * H + Ds + De)
    flops = 4 * H * (Ds + De + H) * M_pad
    bytes_accessed = 4 * (M_pad * (Ds + De)            # inputs
                          + M_pad * (3 * H + Ds + De)  # outputs
                          + weight_elems)              # weights (tiny)
    cost = pl.CostEstimate(flops=flops, transcendentals=0,
                           bytes_accessed=bytes_accessed)

    h_s, h_e, h_f, y_, e_ = pl.pallas_call(
        mmse_kernel,
        out_shape=out_shapes,
        grid=(num_tiles,),
        in_specs=[
            row(Ds), row(De),
            resident(params["ws"]), resident(params["bs"]),
            resident(params["we"]), resident(params["be"]),
            resident(wf_s), resident(wf_e), resident(params["bf"]),
            resident(params["wsd"]), resident(params["bsd"]),
            resident(params["wed"]), resident(params["bed"]),
        ],
        out_specs=out_specs,
        compiler_params=pltpu.CompilerParams(
            dimension_semantics=("parallel",),
            vmem_limit_bytes=32 * 1024 * 1024,   # TM=2048 double-buffered fits on v5e too
        ),
        cost_estimate=cost,
    )(
        s2d, e2d,
        params["ws"], params["bs"],
        params["we"], params["be"],
        wf_s, wf_e, params["bf"],
        params["wsd"], params["bsd"],
        params["wed"], params["bed"],
    )

    if needs_pad:
        h_s, h_e, h_f, y_, e_ = (a[:M] for a in (h_s, h_e, h_f, y_, e_))

    # Leading-dim split reshapes only: no extra HBM pass.
    return (h_s.reshape(N, Seq, H), h_e.reshape(N, Seq, H),
            h_f.reshape(N, Seq, H), y_.reshape(N, Seq, Ds),
            e_.reshape(N, Seq, De))


# ----------------------------------------------------------------------------
# Pure-JAX reference (same math, matches the PyTorch module's concat path).
# ----------------------------------------------------------------------------
def reference_forward(s, e, p):
    h_s = jnp.maximum(s @ p["ws"] + p["bs"], 0.0)
    h_e = jnp.maximum(e @ p["we"] + p["be"], 0.0)
    h = jnp.concatenate([h_s, h_e], axis=-1)
    h_f = jnp.maximum(h @ p["wf"] + p["bf"], 0.0)
    y_ = h_f @ p["wsd"] + p["bsd"]
    e_ = h_f @ p["wed"] + p["bed"]
    return h_s, h_e, h_f, y_, e_


def init_params(key, Ds=257, De=124, H=32):
    ks = jax.random.split(key, 10)

    def lin(kw, kb, din, dout):
        # PyTorch Linear stores (out, in); we store the transpose (in, out)
        w = jax.random.normal(kw, (din, dout), jnp.float32) * (1.0 / jnp.sqrt(din))
        b = jax.random.normal(kb, (1, dout), jnp.float32) * 0.01
        return w, b

    ws, bs = lin(ks[0], ks[1], Ds, H)
    we, be = lin(ks[2], ks[3], De, H)
    wf, bf = lin(ks[4], ks[5], 2 * H, H)
    wsd, bsd = lin(ks[6], ks[7], H, Ds)
    wed, bed = lin(ks[8], ks[9], H, De)
    return dict(ws=ws, bs=bs, we=we, be=be, wf=wf, bf=bf,
                wsd=wsd, bsd=bsd, wed=wed, bed=bed)


if __name__ == "__main__":
    key = jax.random.PRNGKey(0)
    k_s, k_e, k_p = jax.random.split(key, 3)

    N, Seq, Ds, De, H = 2, 8, 257, 124, 32
    s = jax.random.normal(k_s, (N, Seq, Ds), jnp.float32)
    e = jax.random.normal(k_e, (N, Seq, De), jnp.float32)
    params = init_params(k_p, Ds, De, H)

    outs = multimodal_se_forward(s, e, params)
    outs = jax.block_until_ready(outs)

    refs = reference_forward(s, e, params)
    for o, r in zip(outs, refs):
        assert o.shape == r.shape, (o.shape, r.shape)
        assert jnp.max(jnp.abs(o - r)) < 1e-3, float(jnp.max(jnp.abs(o - r)))

    print("KERNEL_OK")
</pallas_src>

<mosaic_0001>
module attributes {stable_mosaic.version = 11 : i64} {
  func.func @mmse_kernel(%arg0: i32, %arg1: memref<8x257xf32, #tpu.memory_space<vmem>>, %arg2: memref<8x124xf32, #tpu.memory_space<vmem>>, %arg3: memref<257x32xf32, #tpu.memory_space<vmem>>, %arg4: memref<1x32xf32, #tpu.memory_space<vmem>>, %arg5: memref<124x32xf32, #tpu.memory_space<vmem>>, %arg6: memref<1x32xf32, #tpu.memory_space<vmem>>, %arg7: memref<32x32xf32, #tpu.memory_space<vmem>>, %arg8: memref<32x32xf32, #tpu.memory_space<vmem>>, %arg9: memref<1x32xf32, #tpu.memory_space<vmem>>, %arg10: memref<32x257xf32, #tpu.memory_space<vmem>>, %arg11: memref<1x257xf32, #tpu.memory_space<vmem>>, %arg12: memref<32x124xf32, #tpu.memory_space<vmem>>, %arg13: memref<1x124xf32, #tpu.memory_space<vmem>>, %arg14: memref<8x32xf32, #tpu.memory_space<vmem>>, %arg15: memref<8x32xf32, #tpu.memory_space<vmem>>, %arg16: memref<8x32xf32, #tpu.memory_space<vmem>>, %arg17: memref<8x257xf32, #tpu.memory_space<vmem>>, %arg18: memref<8x124xf32, #tpu.memory_space<vmem>>) attributes {dimension_semantics = [#tpu.dimension_semantics<parallel>], iteration_bounds = array<i64: 2>, scalar_prefetch = 0 : i64, scratch_operands = 0 : i64, tpu.core_type = #tpu.core_type<tc>, window_params = [{transform_indices = @transform_0, window_bounds = array<i64: 8, 257>}, {transform_indices = @transform_1, window_bounds = array<i64: 8, 124>}, {pipeline_mode = #tpu.pipeline_mode<synchronous>, transform_indices = @transform_2, window_bounds = array<i64: 257, 32>}, {pipeline_mode = #tpu.pipeline_mode<synchronous>, transform_indices = @transform_3, window_bounds = array<i64: 1, 32>}, {pipeline_mode = #tpu.pipeline_mode<synchronous>, transform_indices = @transform_4, window_bounds = array<i64: 124, 32>}, {pipeline_mode = #tpu.pipeline_mode<synchronous>, transform_indices = @transform_5, window_bounds = array<i64: 1, 32>}, {pipeline_mode = #tpu.pipeline_mode<synchronous>, transform_indices = @transform_6, window_bounds = array<i64: 32, 32>}, {pipeline_mode = #tpu.pipeline_mode<synchronous>, transform_indices = @transform_7, window_bounds = array<i64: 32, 32>}, {pipeline_mode = #tpu.pipeline_mode<synchronous>, transform_indices = @transform_8, window_bounds = array<i64: 1, 32>}, {pipeline_mode = #tpu.pipeline_mode<synchronous>, transform_indices = @transform_9, window_bounds = array<i64: 32, 257>}, {pipeline_mode = #tpu.pipeline_mode<synchronous>, transform_indices = @transform_10, window_bounds = array<i64: 1, 257>}, {pipeline_mode = #tpu.pipeline_mode<synchronous>, transform_indices = @transform_11, window_bounds = array<i64: 32, 124>}, {pipeline_mode = #tpu.pipeline_mode<synchronous>, transform_indices = @transform_12, window_bounds = array<i64: 1, 124>}, {transform_indices = @transform_13, window_bounds = array<i64: 8, 32>}, {transform_indices = @transform_14, window_bounds = array<i64: 8, 32>}, {transform_indices = @transform_15, window_bounds = array<i64: 8, 32>}, {transform_indices = @transform_16, window_bounds = array<i64: 8, 257>}, {transform_indices = @transform_17, window_bounds = array<i64: 8, 124>}]} {
    %c0 = arith.constant 0 : index
    %c0_0 = arith.constant 0 : index
    %0 = vector.load %arg1[%c0, %c0_0] : memref<8x257xf32, #tpu.memory_space<vmem>>, vector<8x257xf32>
    %c0_1 = arith.constant 0 : index
    %c0_2 = arith.constant 0 : index
    %1 = vector.load %arg2[%c0_1, %c0_2] : memref<8x124xf32, #tpu.memory_space<vmem>>, vector<8x124xf32>
    %c0_3 = arith.constant 0 : index
    %c0_4 = arith.constant 0 : index
    %2 = vector.load %arg3[%c0_3, %c0_4] : memref<257x32xf32, #tpu.memory_space<vmem>>, vector<257x32xf32>
    %cst = arith.constant dense<0.000000e+00> : vector<8x32xf32>
    %3 = tpu.matmul %0, %2, %cst {dimension_numbers = #tpu.dot_dimension_numbers<[1], [0], [0], [1], [0, 0, 1, 1], [], []>} : vector<8x257xf32>, vector<257x32xf32>, vector<8x32xf32> -> vector<8x32xf32>
    %c0_5 = arith.constant 0 : index
    %c0_6 = arith.constant 0 : index
    %4 = vector.load %arg4[%c0_5, %c0_6] : memref<1x32xf32, #tpu.memory_space<vmem>>, vector<1x32xf32>
    %5 = vector.broadcast %4 : vector<1x32xf32> to vector<8x32xf32>
    %6 = arith.addf %3, %5 : vector<8x32xf32>
    %cst_7 = arith.constant 0.000000e+00 : f32
    %7 = vector.broadcast %cst_7 : f32 to vector<8x32xf32>
    %8 = arith.maximumf %6, %7 : vector<8x32xf32>
    %c0_8 = arith.constant 0 : index
    %c0_9 = arith.constant 0 : index
    %9 = vector.load %arg5[%c0_8, %c0_9] : memref<124x32xf32, #tpu.memory_space<vmem>>, vector<124x32xf32>
    %cst_10 = arith.constant dense<0.000000e+00> : vector<8x32xf32>
    %10 = tpu.matmul %1, %9, %cst_10 {dimension_numbers = #tpu.dot_dimension_numbers<[1], [0], [0], [1], [0, 0, 1, 1], [], []>} : vector<8x124xf32>, vector<124x32xf32>, vector<8x32xf32> -> vector<8x32xf32>
    %c0_11 = arith.constant 0 : index
    %c0_12 = arith.constant 0 : index
    %11 = vector.load %arg6[%c0_11, %c0_12] : memref<1x32xf32, #tpu.memory_space<vmem>>, vector<1x32xf32>
    %12 = vector.broadcast %11 : vector<1x32xf32> to vector<8x32xf32>
    %13 = arith.addf %10, %12 : vector<8x32xf32>
    %cst_13 = arith.constant 0.000000e+00 : f32
    %14 = vector.broadcast %cst_13 : f32 to vector<8x32xf32>
    %15 = arith.maximumf %13, %14 : vector<8x32xf32>
    %c0_14 = arith.constant 0 : index
    %c0_15 = arith.constant 0 : index
    %16 = vector.load %arg7[%c0_14, %c0_15] : memref<32x32xf32, #tpu.memory_space<vmem>>, vector<32x32xf32>
    %cst_16 = arith.constant dense<0.000000e+00> : vector<8x32xf32>
    %17 = tpu.matmul %8, %16, %cst_16 {dimension_numbers = #tpu.dot_dimension_numbers<[1], [0], [0], [1], [0, 0, 1, 1], [], []>} : vector<8x32xf32>, vector<32x32xf32>, vector<8x32xf32> -> vector<8x32xf32>
    %c0_17 = arith.constant 0 : index
    %c0_18 = arith.constant 0 : index
    %18 = vector.load %arg8[%c0_17, %c0_18] : memref<32x32xf32, #tpu.memory_space<vmem>>, vector<32x32xf32>
    %cst_19 = arith.constant dense<0.000000e+00> : vector<8x32xf32>
    %19 = tpu.matmul %15, %18, %cst_19 {dimension_numbers = #tpu.dot_dimension_numbers<[1], [0], [0], [1], [0, 0, 1, 1], [], []>} : vector<8x32xf32>, vector<32x32xf32>, vector<8x32xf32> -> vector<8x32xf32>
    %20 = arith.addf %17, %19 : vector<8x32xf32>
    %c0_20 = arith.constant 0 : index
    %c0_21 = arith.constant 0 : index
    %21 = vector.load %arg9[%c0_20, %c0_21] : memref<1x32xf32, #tpu.memory_space<vmem>>, vector<1x32xf32>
    %22 = vector.broadcast %21 : vector<1x32xf32> to vector<8x32xf32>
    %23 = arith.addf %20, %22 : vector<8x32xf32>
    %cst_22 = arith.constant 0.000000e+00 : f32
    %24 = vector.broadcast %cst_22 : f32 to vector<8x32xf32>
    %25 = arith.maximumf %23, %24 : vector<8x32xf32>
    %c0_23 = arith.constant 0 : index
    %c0_24 = arith.constant 0 : index
    %26 = vector.load %arg14[%c0_23, %c0_24] : memref<8x32xf32, #tpu.memory_space<vmem>>, vector<8x32xf32>
    tpu.vector_store %arg14[%c0_23, %c0_24], %8 {strides = array<i32>} : memref<8x32xf32, #tpu.memory_space<vmem>>, vector<8x32xf32>,
    %c0_25 = arith.constant 0 : index
    %c0_26 = arith.constant 0 : index
    %27 = vector.load %arg15[%c0_25, %c0_26] : memref<8x32xf32, #tpu.memory_space<vmem>>, vector<8x32xf32>
    tpu.vector_store %arg15[%c0_25, %c0_26], %15 {strides = array<i32>} : memref<8x32xf32, #tpu.memory_space<vmem>>, vector<8x32xf32>,
    %c0_27 = arith.constant 0 : index
    %c0_28 = arith.constant 0 : index
    %28 = vector.load %arg16[%c0_27, %c0_28] : memref<8x32xf32, #tpu.memory_space<vmem>>, vector<8x32xf32>
    tpu.vector_store %arg16[%c0_27, %c0_28], %25 {strides = array<i32>} : memref<8x32xf32, #tpu.memory_space<vmem>>, vector<8x32xf32>,
    %c0_29 = arith.constant 0 : index
    %c0_30 = arith.constant 0 : index
    %29 = vector.load %arg10[%c0_29, %c0_30] : memref<32x257xf32, #tpu.memory_space<vmem>>, vector<32x257xf32>
    %cst_31 = arith.constant dense<0.000000e+00> : vector<8x257xf32>
    %30 = tpu.matmul %25, %29, %cst_31 {dimension_numbers = #tpu.dot_dimension_numbers<[1], [0], [0], [1], [0, 0, 1, 1], [], []>} : vector<8x32xf32>, vector<32x257xf32>, vector<8x257xf32> -> vector<8x257xf32>
    %c0_32 = arith.constant 0 : index
    %c0_33 = arith.constant 0 : index
    %31 = vector.load %arg11[%c0_32, %c0_33] : memref<1x257xf32, #tpu.memory_space<vmem>>, vector<1x257xf32>
    %32 = vector.broadcast %31 : vector<1x257xf32> to vector<8x257xf32>
    %33 = arith.addf %30, %32 : vector<8x257xf32>
    %c0_34 = arith.constant 0 : index
    %c0_35 = arith.constant 0 : index
    %34 = vector.load %arg17[%c0_34, %c0_35] : memref<8x257xf32, #tpu.memory_space<vmem>>, vector<8x257xf32>
    tpu.vector_store %arg17[%c0_34, %c0_35], %33 {strides = array<i32>} : memref<8x257xf32, #tpu.memory_space<vmem>>, vector<8x257xf32>,
    %c0_36 = arith.constant 0 : index
    %c0_37 = arith.constant 0 : index
    %35 = vector.load %arg12[%c0_36, %c0_37] : memref<32x124xf32, #tpu.memory_space<vmem>>, vector<32x124xf32>
    %cst_38 = arith.constant dense<0.000000e+00> : vector<8x124xf32>
    %36 = tpu.matmul %25, %35, %cst_38 {dimension_numbers = #tpu.dot_dimension_numbers<[1], [0], [0], [1], [0, 0, 1, 1], [], []>} : vector<8x32xf32>, vector<32x124xf32>, vector<8x124xf32> -> vector<8x124xf32>
    %c0_39 = arith.constant 0 : index
    %c0_40 = arith.constant 0 : index
    %37 = vector.load %arg13[%c0_39, %c0_40] : memref<1x124xf32, #tpu.memory_space<vmem>>, vector<1x124xf32>
    %38 = vector.broadcast %37 : vector<1x124xf32> to vector<8x124xf32>
    %39 = arith.addf %36, %38 : vector<8x124xf32>
    %c0_41 = arith.constant 0 : index
    %c0_42 = arith.constant 0 : index
    %40 = vector.load %arg18[%c0_41, %c0_42] : memref<8x124xf32, #tpu.memory_space<vmem>>, vector<8x124xf32>
    tpu.vector_store %arg18[%c0_41, %c0_42], %39 {strides = array<i32>} : memref<8x124xf32, #tpu.memory_space<vmem>>, vector<8x124xf32>,
    return
  }
  func.func @transform_0(%arg0: i32) -> (i32, i32) {
    %c0_i32 = arith.constant 0 : i32
    %c0_i32_0 = arith.constant 0 : i32
    return %arg0, %c0_i32 : i32, i32
  }
  func.func @transform_1(%arg0: i32) -> (i32, i32) {
    %c0_i32 = arith.constant 0 : i32
    %c0_i32_0 = arith.constant 0 : i32
    return %arg0, %c0_i32 : i32, i32
  }
  func.func @transform_2(%arg0: i32) -> (i32, i32) {
    %c0_i32 = arith.constant 0 : i32
    %c0_i32_0 = arith.constant 0 : i32
    %c0_i32_1 = arith.constant 0 : i32
    return %c0_i32, %c0_i32_0 : i32, i32
  }
  func.func @transform_3(%arg0: i32) -> (i32, i32) {
    %c0_i32 = arith.constant 0 : i32
    %c0_i32_0 = arith.constant 0 : i32
    %c0_i32_1 = arith.constant 0 : i32
    return %c0_i32, %c0_i32_0 : i32, i32
  }
  func.func @transform_4(%arg0: i32) -> (i32, i32) {
    %c0_i32 = arith.constant 0 : i32
    %c0_i32_0 = arith.constant 0 : i32
    %c0_i32_1 = arith.constant 0 : i32
    return %c0_i32, %c0_i32_0 : i32, i32
  }
  func.func @transform_5(%arg0: i32) -> (i32, i32) {
    %c0_i32 = arith.constant 0 : i32
    %c0_i32_0 = arith.constant 0 : i32
    %c0_i32_1 = arith.constant 0 : i32
    return %c0_i32, %c0_i32_0 : i32, i32
  }
  func.func @transform_6(%arg0: i32) -> (i32, i32) {
    %c0_i32 = arith.constant 0 : i32
    %c0_i32_0 = arith.constant 0 : i32
    %c0_i32_1 = arith.constant 0 : i32
    return %c0_i32, %c0_i32_0 : i32, i32
  }
  func.func @transform_7(%arg0: i32) -> (i32, i32) {
    %c0_i32 = arith.constant 0 : i32
    %c0_i32_0 = arith.constant 0 : i32
    %c0_i32_1 = arith.constant 0 : i32
    return %c0_i32, %c0_i32_0 : i32, i32
  }
  func.func @transform_8(%arg0: i32) -> (i32, i32) {
    %c0_i32 = arith.constant 0 : i32
    %c0_i32_0 = arith.constant 0 : i32
    %c0_i32_1 = arith.constant 0 : i32
    return %c0_i32, %c0_i32_0 : i32, i32
  }
  func.func @transform_9(%arg0: i32) -> (i32, i32) {
    %c0_i32 = arith.constant 0 : i32
    %c0_i32_0 = arith.constant 0 : i32
    %c0_i32_1 = arith.constant 0 : i32
    return %c0_i32, %c0_i32_0 : i32, i32
  }
  func.func @transform_10(%arg0: i32) -> (i32, i32) {
    %c0_i32 = arith.constant 0 : i32
    %c0_i32_0 = arith.constant 0 : i32
    %c0_i32_1 = arith.constant 0 : i32
    return %c0_i32, %c0_i32_0 : i32, i32
  }
  func.func @transform_11(%arg0: i32) -> (i32, i32) {
    %c0_i32 = arith.constant 0 : i32
    %c0_i32_0 = arith.constant 0 : i32
    %c0_i32_1 = arith.constant 0 : i32
    return %c0_i32, %c0_i32_0 : i32, i32
  }
  func.func @transform_12(%arg0: i32) -> (i32, i32) {
    %c0_i32 = arith.constant 0 : i32
    %c0_i32_0 = arith.constant 0 : i32
    %c0_i32_1 = arith.constant 0 : i32
    return %c0_i32, %c0_i32_0 : i32, i32
  }
  func.func @transform_13(%arg0: i32) -> (i32, i32) {
    %c0_i32 = arith.constant 0 : i32
    %c0_i32_0 = arith.constant 0 : i32
    return %arg0, %c0_i32 : i32, i32
  }
  func.func @transform_14(%arg0: i32) -> (i32, i32) {
    %c0_i32 = arith.constant 0 : i32
    %c0_i32_0 = arith.constant 0 : i32
    return %arg0, %c0_i32 : i32, i32
  }
  func.func @transform_15(%arg0: i32) -> (i32, i32) {
    %c0_i32 = arith.constant 0 : i32
    %c0_i32_0 = arith.constant 0 : i32
    return %arg0, %c0_i32 : i32, i32
  }
  func.func @transform_16(%arg0: i32) -> (i32, i32) {
    %c0_i32 = arith.constant 0 : i32
    %c0_i32_0 = arith.constant 0 : i32
    return %arg0, %c0_i32 : i32, i32
  }
  func.func @transform_17(%arg0: i32) -> (i32, i32) {
    %c0_i32 = arith.constant 0 : i32
    %c0_i32_0 = arith.constant 0 : i32
    return %arg0, %c0_i32 : i32, i32
  }
}

</mosaic_0001>

<bundles_post_ra>
// kernel: tpu_custom_call.1
= control target key start
LH: loop header
LB: loop body
LE: loop exit
PB: predicated region body
PF: predicated region fallthrough
CT: control target
= control target key end

     0   :  { %s2051_s0 = inlined_call_operand.vmem [shape: f32[16,257], index: 0, kind: input, shape index: {}]   ;;  %s2052_s1 = inlined_call_operand.vmem [shape: f32[16,124], index: 1, kind: input, shape index: {}]   ;;  %s2053_s2 = inlined_call_operand.vmem [shape: f32[257,32], index: 2, kind: input, shape index: {}]   ;;  %s2054_s3 = inlined_call_operand.vmem [shape: f32[1,32], index: 3, kind: input, shape index: {}]   ;;  %s2055_s4 = inlined_call_operand.vmem [shape: f32[124,32], index: 4, kind: input, shape index: {}]   ;;  %s2056_s5 = inlined_call_operand.vmem [shape: f32[1,32], index: 5, kind: input, shape index: {}]   ;;  %s2057_s6 = inlined_call_operand.vmem [shape: f32[32,32], index: 6, kind: input, shape index: {}]   ;;  %s2058_s7 = inlined_call_operand.vmem [shape: f32[32,32], index: 7, kind: input, shape index: {}]   ;;  %s2059_s8 = inlined_call_operand.vmem [shape: f32[1,32], index: 8, kind: input, shape index: {}]   ;;  %s2060_s9 = inlined_call_operand.vmem [shape: f32[32,257], index: 9, kind: input, shape index: {}]   ;;  %s2061_s10 = inlined_call_operand.vmem [shape: f32[1,257], index: 10, kind: input, shape index: {}]   ;;  %s2062_s11 = inlined_call_operand.vmem [shape: f32[32,124], index: 11, kind: input, shape index: {}]   ;;  %s2063_s12 = inlined_call_operand.vmem [shape: f32[1,124], index: 12, kind: input, shape index: {}]   ;;  %s2064_s13 = inlined_call_operand.hbm [shape: f32[16,32], index: 13, kind: output, shape index: {0}]   ;;  %s2065_s14 = inlined_call_operand.hbm [shape: f32[16,32], index: 14, kind: output, shape index: {1}]   ;;  %s2066_s15 = inlined_call_operand.hbm [shape: f32[16,32], index: 15, kind: output, shape index: {2}]   ;;  %s2067_s16 = inlined_call_operand.hbm [shape: f32[16,257], index: 16, kind: output, shape index: {3}]   ;;  %s2068_s17 = inlined_call_operand.hbm [shape: f32[16,124], index: 17, kind: output, shape index: {4}]  }
   0x1   :  { %2082 = sst [smem:[#allocation19_spill]] %s2051_s0 }
   0x2   :  { %2083 = sst [smem:[#allocation20_spill]] %s2052_s1 }
   0x3   :  { %2084 = sst [smem:[#allocation21_spill]] %s2053_s2 }
   0x4   :  { %2085 = sst [smem:[#allocation22_spill]] %s2054_s3 }
   0x5   :  { %2086 = sst [smem:[#allocation23_spill]] %s2055_s4 }
   0x6   :  { %2087 = sst [smem:[#allocation24_spill]] %s2056_s5 }
   0x7   :  { %2088 = sst [smem:[#allocation25_spill]] %s2067_s16 }
   0x8   :  { %2089 = sst [smem:[#allocation26_spill]] %s2068_s17 }
   0x9   :  { %23 = vsyncpa [#allocation3], 0 }
   0xa   :  { %25 = vsyncpa [#allocation3 + $0x1], 0 }
   0xb   :  { %26 = vsyncpa [#allocation5], 0 }
   0xc   :  { %28 = vsyncpa [#allocation5 + $0x1], 0 }
   0xd   :  { %29 = vsyncpa [#allocation8], 0 }
   0xe   :  { %31 = vsyncpa [#allocation8 + $0x1], 0  ;;  %s1598_s24 = smov 0   ;;  %s1600_s25 = smov 0  }
   0xf   :  { %s1602_s26 = smov 0   ;;  %s1604_s27 = smov 0  }
  0x10 LB: > { %2090 = sst [smem:[#allocation13_spill]] %s1494_s24  ;;  %s1619_s28 = sadd.s32 4294967295, %s1506_s27   ;;  %s1506_s27 = sphi %s1604_s27, %s2113_s27   ;;  %s1502_s26 = sphi %s1602_s26, %s2115_s26   ;;  %s1498_s25 = sphi %s1600_s25, %s2117_s25   ;;  %s1494_s24 = sphi %s1598_s24, %s2116_s24  }
  0x11   : > { %2091 = sst [smem:[#allocation14_spill]] %s1502_s26  ;;  %s2069_s29 = sadd.s32 4294967294, %s1506_s27  }
  0x12   : > { %2092 = sst [smem:[#allocation15_spill]] %s1506_s27  ;;  %s1623_s0 = sadd.s32 1, %s1506_s27  }
  0x13   : > { %2093 = sst [smem:[#allocation16_spill]] %s1623_s0  ;;  %s327_s30 = sadd.s32 1, %s1502_s26 }
  0x14   : > { %s324_s18 = ssub.s32 %s1506_s27, %s1623_s0  ;;  %p337_p0 = scmp.ne.s32.totalorder %s1502_s26, %s1498_s25 }
  0x15   : > { %p325_p1 = scmp.eq.s32.totalorder %s324_s18, 0  ;;  %p338_p2 = scmp.eq.s32.totalorder %s1619_s28, 1 }
  0x16   : > { %p343_p3 = scmp.ne.s32.totalorder %s1498_s25, %s1494_s24  ;;  %p344_p4 = scmp.eq.s32.totalorder %s2069_s29, 1 }
  0x17   : > { %s1636_s19 = scalar_select %p325_p1, %s1502_s26, %s327_s30  }
  0x18   : > { %p1638_p5 = por %p338_p2, %p337_p0  ;;  %p1642_p6 = por %p344_p4, %p343_p3 }
  0x19   : > { %2094 = sst [smem:[#allocation17_spill]] %s1636_s19  ;;  %p1230_p7 = scmp.ge.s32.totalorder %s1506_s27, 1 }
  0x1a   : > { %s2096_s20 = scalar_select %p1642_p6, 1, 0 }
  0x1b   : > { %p514_p8 = scmp.lt.s32.totalorder %s1506_s27, 3 }
  0x1c   : > { %2097 = sst [smem:[#allocation18_spill]] %s2096_s20 }
  0x1d   : > { %p515_p9 = pnand %p1230_p7, %p514_p8 }
  0x1e   : > { %s2098_s4 = sld [smem:[#allocation23_spill]] (!%p515_p9)  ;;  %p590_p10 = scmp.lt.s32.totalorder (!%p515_p9), %s1619_s28, 1 }
  0x1f   : > { %518 = sbr.rel (%p515_p9) target bundleno = 507 (0x1fb), region = 72  ;;  %s2099_s2 = sld [smem:[#allocation21_spill]] (!%p515_p9) }
  0x20   : > { %s2100_s17 = sld [smem:[#allocation19_spill]] (!%p515_p9)  ;;  %s1344_s21 = scalar_lea.hbm (!%p515_p9), %s2065_s14, 16 }
  0x21   : > { %s2101_s26 = sld [smem:[#allocation20_spill]] (!%p515_p9) }
  0x22   : > { %s2102_s3 = sld [smem:[#allocation22_spill]] (!%p515_p9) }
  0x23   : > { %s2103_s5 = sld [smem:[#allocation24_spill]] (!%p515_p9) }
  0x24   : > { %v724_v0 = vld [vmem:[%s2098_s4 + $0x78] sm:$0xf]  ;;  %vm733_vm0 = vcmask 1043456   ;;  %v723_v1 = vld [vmem:[%s2098_s4 + $0x70] sm:$0xff]  ;;  %v722_v3 = vld [vmem:[%s2098_s4 + $0x68] sm:$0xff]  ;;  %s1691_s30 = scalar_select %p590_p10, %s1619_s28, 1 }
  0x25   : > { %1239 = vmatpush.msk.msra.mxu3 %vm733_vm0, %v724_v0  ;;  %v618_v2 = vld [vmem:[%s2099_s2 + $0x78] sm:$0xff]  ;;  %v617_v4 = vld [vmem:[%s2099_s2 + $0x70] sm:$0xff]  ;;  %v616_v6 = vld [vmem:[%s2099_s2 + $0x68] sm:$0xff]  ;;  %vm644_vm1 = vcmask 1040384   ;;  %vm640_vm2 = vcmask 7168   ;;  %vm729_vm3 = vcmask 1014784  }
  0x26   : > { %648 = vmatpush.msra.mxu0 %v618_v2  ;;  %v634_v5 = vld [vmem:[%s2099_s2 + $0xf8] sm:$0xff]  ;;  %v633_v7 = vld [vmem:[%s2099_s2 + $0xf0] sm:$0xff]  ;;  %v721_v8 = vld [vmem:[%s2098_s4 + $0x60] sm:$0xff]  ;;  %s1259_s23 = smul.u32 24, %s1691_s30  ;;  %s1236_s22 = sshll.u32 %s1691_s30, 3  ;;  %vm766_vm4 = vcmask 261120  }
  0x27   : > { %738 = vmatpush.msra.mxu3 %v723_v1  ;;  %668 = vmatpush.msra.mxu1 %v634_v5  ;;  %v632_v9 = vld [vmem:[%s2099_s2 + $0xe8] sm:$0xff]  ;;  %v615_v10 = vld [vmem:[%s2099_s2 + $0x60] sm:$0xff]  ;;  %v720_v11 = vld [vmem:[%s2098_s4 + $0x58] sm:$0xff] }
  0x28   : > { %649 = vmatpush.msra.mxu0 %v617_v4  ;;  %v631_v12 = vld [vmem:[%s2099_s2 + $0xe0] sm:$0xff]  ;;  %v614_v13 = vld [vmem:[%s2099_s2 + $0x58] sm:$0xff]  ;;  %v719_v14 = vld [vmem:[%s2098_s4 + $0x50] sm:$0xff]  ;;  %s1724_s0 = scalar_lea.vmem %s2100_s17, %s1259_s23  ;;  %s598_s17 = scalar_lea.vmem %s2101_s26, %s1236_s22 }
  0x29   : > { %739 = vmatpush.msra.mxu3 %v722_v3  ;;  %669 = vmatpush.msra.mxu1 %v633_v7  ;;  %v630_v15 = vld [vmem:[%s2099_s2 + $0xd8] sm:$0xff]  ;;  %v613_v16 = vld [vmem:[%s2099_s2 + $0x50] sm:$0xff]  ;;  %v718_v17 = vld [vmem:[%s2098_s4 + $0x48] sm:$0xff]  ;;  %s1844_s26 = sand.u32 1, %s1498_s25   ;;  %s1922_s22 = sshll.u32 %s1619_s28, 3 }
  0x2a   : > { %650 = vmatpush.msra.mxu0 %v616_v6  ;;  %v629_v18 = vld [vmem:[%s2099_s2 + $0xd0] sm:$0xff]  ;;  %v612_v19 = vld [vmem:[%s2099_s2 + $0x48] sm:$0xff]  ;;  %v717_v20 = vld [vmem:[%s2098_s4 + $0x40] sm:$0xff]  ;;  %s1850_s19 = sshll.u32 %s1844_s26, 3  ;;  %s2081_s23 = sand.u32 1, %s1619_s28  }
  0x2b   : > { %740 = vmatpush.msra.mxu3 %v721_v8  ;;  %670 = vmatpush.msra.mxu1 %v632_v9  ;;  %v628_v21 = vld [vmem:[%s2099_s2 + $0xc8] sm:$0xff]  ;;  %v611_v22 = vld [vmem:[%s2099_s2 + $0x40] sm:$0xff]  ;;  %v716_v23 = vld [vmem:[%s2098_s4 + $0x38] sm:$0xff]  ;;  %s2080_s24 = scalar_lea.vmem [#allocation2], %s1850_s19  ;;  %s568_s27 = scalar_lea.vmem [#allocation4], %s1850_s19 }
  0x2c   : > { %651 = vmatpush.msra.mxu0 %v615_v10  ;;  %v627_v24 = vld [vmem:[%s2099_s2 + $0xc0] sm:$0xff]  ;;  %v610_v25 = vld [vmem:[%s2099_s2 + $0x38] sm:$0xff]  ;;  %v601_v27 = vld [vmem:[%s1724_s0 + $0x10] sm:$0xff]  ;;  %s2079_s16 = scalar_lea.vmem [#allocation6], %s1850_s19  ;;  %s1933_s30 = scalar_lea.sflag [#allocation5], %s2081_s23 }
  0x2d   : > { %741 = vmatpush.msra.mxu3 %v720_v11  ;;  %671 = vmatpush.msra.mxu1 %v631_v12  ;;  %v635_v26 = vld [vmem:[%s2099_s2 + $0x100] sm:$0x1]  ;;  %v715_v28 = vld [vmem:[%s2098_s4 + $0x30] sm:$0xff]  ;;  %v714_v29 = vld [vmem:[%s2098_s4 + $0x28] sm:$0xff] }
  0x2e   : > { %652 = vmatpush.msra.mxu0 %v614_v13  ;;  %v626_v30 = vld [vmem:[%s2099_s2 + $0xb8] sm:$0xff]  ;;  %1237 = vmatpush.msk.msra.mxu2 %vm644_vm1, %v635_v26  ;;  %v609_v31 = vld [vmem:[%s2099_s2 + $0x30] sm:$0xff]  ;;  %v608_v32 = vld [vmem:[%s2099_s2 + $0x28] sm:$0xff] }
  0x2f   : > { %742 = vmatpush.msra.mxu3 %v719_v14  ;;  %672 = vmatpush.msra.mxu1 %v630_v15  ;;  %v765_v33 = vld [vmem:[%s2058_s7 + $0x18] sm:$0xff]  ;;  %v625_v34 = vld [vmem:[%s2099_s2 + $0xb0] sm:$0xff]  ;;  %v713_v36 = vld [vmem:[%s2098_s4 + $0x20] sm:$0xff] }
  0x30   : > { %653 = vmatpush.msra.mxu0 %v613_v16  ;;  %1238 = vmatmul.msk.f32.vlgmr.msra.gmra.mxu2 %vm640_vm2, %v601_v27  ;;  %v764_v35 = vld [vmem:[%s2058_s7 + $0x10] sm:$0xff]  ;;  %v624_v37 = vld [vmem:[%s2099_s2 + $0xa8] sm:$0xff]  ;;  %v607_v38 = vld [vmem:[%s2099_s2 + $0x20] sm:$0xff] }
  0x31   : > { %743 = vmatpush.msra.mxu3 %v718_v17  ;;  %673 = vmatpush.msra.mxu1 %v629_v18  ;;  %v712_v39 = vld [vmem:[%s2098_s4 + $0x18] sm:$0xff]  ;;  %v623_v40 = vld [vmem:[%s2099_s2 + $0xa0] sm:$0xff]  ;;  %v711_v42 = vld [vmem:[%s2098_s4 + $0x10] sm:$0xff] }
  0x32   : > { %654 = vmatpush.msra.mxu0 %v612_v19  ;;  %782 = vmatpush.msrb.mxu2 %v765_v33  ;;  %v606_v41 = vld [vmem:[%s2099_s2 + $0x18] sm:$0xff]  ;;  %v605_v44 = vld [vmem:[%s2099_s2 + $0x10] sm:$0xff]  ;;  %v710_v45 = vld [vmem:[%s2098_s4 + $0x8] sm:$0xff] }
  0x33   : > { %744 = vmatpush.msra.mxu3 %v717_v20  ;;  %674 = vmatpush.msra.mxu1 %v628_v21  ;;  %v622_v43 = vld [vmem:[%s2099_s2 + $0x98] sm:$0xff]  ;;  %v621_v46 = vld [vmem:[%s2099_s2 + $0x90] sm:$0xff]  ;;  %v604_v47 = vld [vmem:[%s2099_s2 + $0x8] sm:$0xff] }
  0x34   : > { %655 = vmatpush.msra.mxu0 %v611_v22  ;;  %783 = vmatpush.msrb.mxu2 %v764_v35  ;;  %v709_v48 = vld [vmem:[%s2098_s4] sm:$0xff]  ;;  %v620_v49 = vld [vmem:[%s2099_s2 + $0x88] sm:$0xff]  ;;  %v761_v57 = vld [vmem:[%s2057_s6 + $0x18] sm:$0xff] }
  0x35   : > { %745 = vmatpush.msra.mxu3 %v716_v23  ;;  %675 = vmatpush.msra.mxu1 %v627_v24  ;;  %v602_v50 = vld [vmem:[%s598_s17] sm:$0xff]  ;;  %v600_v54 = vld [vmem:[%s1724_s0 + $0x8] sm:$0xff]  ;;  %v760_v58 = vld [vmem:[%s2057_s6 + $0x10] sm:$0xff]  ;;  %s982_s17 = scalar_lea.hbm %s2065_s14, %s1922_s22 }
  0x36   : > { %656 = vmatpush.msra.mxu0 %v610_v25  ;;  %v603_v51 = vld [vmem:[%s2099_s2] sm:$0xff]  ;;  %v763_v55 = vld [vmem:[%s2058_s7 + $0x8] sm:$0xff]  ;;  %v833_v10 = vld [vmem:[%s2060_s9 + $0x58] sm:$0xff]  ;;  %s986_s20 = sshll.u32 %s982_s17, 4  ;;  %s987_s20 = int_to_ptr.hbm [resolvable:$true] %s986_s20 }
  0x37   : > { %746 = vmatpush.msra.mxu3 %v715_v28  ;;  %676 = vmatpush.msra.mxu1 %v626_v30  ;;  %v599_v52 = vld [vmem:[%s1724_s0] sm:$0xff]  ;;  %v759_v59 = vld [vmem:[%s2057_s6 + $0x8] sm:$0xff]  ;;  %v911_v11 = vld [vmem:[%s2062_s11 + $0x18] sm:$0xff]  ;;  %s984_s0 = sshll.u32 %s568_s27, 4  ;;  %s1338_s18 = sshra.s32 %s987_s20, 4  ;;  %s985_s0 = int_to_ptr.vmem [resolvable:$true] %s984_s0  ;;  %s1339_s18 = int_to_ptr.hbm [resolvable:$true] %s1338_s18 }
  0x38   : > { %657 = vmatpush.msra.mxu0 %v609_v31  ;;  %v619_v53 = vld [vmem:[%s2099_s2 + $0x80] sm:$0xff]  ;;  %784 = vmatpush.msrb.mxu2 %v763_v55  ;;  %v831_v9 = vld [vmem:[%s2060_s9 + $0x48] sm:$0xff]  ;;  %v828_v12 = vld [vmem:[%s2060_s9 + $0x30] sm:$0xff]  ;;  %p1345_p0 = scmp.lt.s32.totalorder %s1339_s18, %s2065_s14 }
  0x39   : > { %747 = vmatpush.msra.mxu3 %v714_v29  ;;  %677 = vmatpush.msra.mxu1 %v625_v34  ;;  %v762_v56 = vld [vmem:[%s2058_s7] sm:$0xff]  ;;  %v910_v14 = vld [vmem:[%s2062_s11 + $0x10] sm:$0xff]  ;;  %v825_v15 = vld [vmem:[%s2060_s9 + $0x18] sm:$0xff] }
  0x3a   : > { %658 = vmatpush.msra.mxu0 %v608_v32  ;;  %785 = vmatpush.msrb.mxu2 %v762_v56  ;;  %v758_v60 = vld [vmem:[%s2057_s6] sm:$0xff]  ;;  %v827_v16 = vld [vmem:[%s2060_s9 + $0x28] sm:$0xff]  ;;  %v824_v19 = vld [vmem:[%s2060_s9 + $0x10] sm:$0xff] }
  0x3b   : > { %748 = vmatpush.msra.mxu3 %v713_v36  ;;  %678 = vmatpush.msra.mxu1 %v624_v37  ;;  %v1321_v61 = vld [vmem:[%s2102_s3] ss:$0 sm:$0xff]  ;;  %v909_v17 = vld [vmem:[%s2062_s11 + $0x8] sm:$0xff]  ;;  %v832_v21 = vld [vmem:[%s2060_s9 + $0x50] sm:$0xff] }
  0x3c   : > { %659 = vmatpush.msra.mxu0 %v607_v38  ;;  %805 = vmatpush.msra.mxu2 %v761_v57  ;;  %v1320_v1 = vld [vmem:[%s2103_s5] ss:$0 sm:$0xff]  ;;  %v829_v22 = vld [vmem:[%s2060_s9 + $0x38] sm:$0xff]  ;;  %v823_v24 = vld [vmem:[%s2060_s9 + $0x8] sm:$0xff] }
  0x3d   : > { %749 = vmatpush.msra.mxu3 %v712_v39  ;;  %679 = vmatpush.msra.mxu1 %v623_v40  ;;  %v830_v13 = vld [vmem:[%s2060_s9 + $0x40] sm:$0xff] }
  0x3e   : > { %660 = vmatpush.msra.mxu0 %v606_v41  ;;  %806 = vmatpush.msra.mxu2 %v760_v58  ;;  %v822_v18 = vld [vmem:[%s2060_s9] sm:$0xff] }
  0x3f   : > { %750 = vmatpush.msra.mxu3 %v711_v42  ;;  %680 = vmatpush.msra.mxu1 %v622_v43  ;;  %v908_v20 = vld [vmem:[%s2062_s11] sm:$0xff] }
  0x40   : > { %661 = vmatpush.msra.mxu0 %v605_v44  ;;  %807 = vmatpush.msra.mxu2 %v759_v59  ;;  %v826_v23 = vld [vmem:[%s2060_s9 + $0x20] sm:$0xff] }
  0x41   : > { %751 = vmatpush.msra.mxu3 %v710_v45  ;;  %681 = vmatpush.msra.mxu1 %v621_v46  ;;  %v1322_v26 = vld [vmem:[%s2059_s8] ss:$0 sm:$0xff] }
  0x42   : > { %662 = vmatpush.msra.mxu0 %v604_v47  ;;  %808 = vmatpush.msra.mxu2 %v758_v60 }
  0x43   : > { %752 = vmatpush.msra.mxu3 %v709_v48  ;;  %682 = vmatpush.msra.mxu1 %v620_v49 }
  0x44   : > { %1240 = vmatmul.msk.f32.vlgmr.msra.gmra.mxu3 %vm729_vm3, %v602_v50  ;;  %663 = vmatpush.msra.mxu0 %v603_v51 }
  0x45   : > { %664 = vmatmul.f32.vlgmr.msra.gmra.mxu0 %v599_v52  ;;  %683 = vmatpush.msra.mxu1 %v619_v53 }
  0x46   : > { %684 = vmatmul.f32.vlgmr.msra.gmra.mxu1 %v600_v54  ;;  %897 = vmatpush.msrb.mxu0 %v833_v10 }
  0x47   : > { %928 = vmatpush.msrb.mxu1 %v911_v11 }
  0x48   : > { %898 = vmatpush.msrb.mxu0 %v830_v13 }
  0x49   : > { %929 = vmatpush.msrb.mxu1 %v910_v14 }
  0x4a   : > { %899 = vmatpush.msrb.mxu0 %v827_v16 }
  0x4b   : > { %930 = vmatpush.msrb.mxu1 %v909_v17 }
  0x4c   : > { %900 = vmatpush.msrb.mxu0 %v824_v19 }
  0x4d   : > { %931 = vmatpush.msrb.mxu1 %v908_v20 }
  0xb3   : > { %v705_v2 = vpop.f32.mrf.mxu2 }
  0xc2   : > { %v665_v62 = vpop.f32.mrf.mxu0 }
  0xc3   : > { %v666_v63 = vadd.f32 %v1321_v61, %v665_v62  ;;  %v685_v0 = vpop.f32.mrf.mxu1 }
  0xc5   : > { %v686_v3 = vadd.f32 %v685_v0, %v666_v63 }
  0xc7   : > { %v754_v4 = vpop.f32.mrf.mxu3  ;;  %v706_v5 = vadd.f32 %v705_v2, %v686_v3 }
  0xc8   : > { %v755_v6 = vadd.f32 %v1320_v1, %v754_v4 }
  0xc9   : > { %v708_v7 = vmax.f32 %v706_v5, 0.0 }
  0xca   : > { %v757_v8 = vmax.f32 %v755_v6, 0.0 }
  0xcb   : > { %819 = vst.msk [vmem:[%s2080_s24] sm:$0xff] %vm766_vm4, %v708_v7 }
  0xcc   : > { %1241 = vmatmul.msk.f32.vlgmr.msrb.gmra.mxu2 %vm766_vm4, %v757_v8  ;;  %820 = vst.msk [vmem:[%s568_s27] sm:$0xff] %vm766_vm4, %v757_v8 }
  0xcd   : > { %857 = vmatpush.msrb.mxu2 %v831_v9 }
  0xcf   : > { %858 = vmatpush.msrb.mxu2 %v828_v12 }
  0xd1   : > { %859 = vmatpush.msrb.mxu2 %v825_v15 }
  0xd3   : > { %860 = vmatpush.msrb.mxu2 %v822_v18 }
  0xd4   : > { %1242 = vmatmul.msk.f32.vlgmr.msra.gmra.mxu2 %vm766_vm4, %v708_v7 }
  0xd5   : > { %877 = vmatpush.msra.mxu2 %v832_v21 }
  0xd7   : > { %878 = vmatpush.msra.mxu2 %v829_v22 }
  0xd9   : > { %879 = vmatpush.msra.mxu2 %v826_v23 }
  0xdb   : > { %880 = vmatpush.msra.mxu2 %v823_v24 }
 0x14f   : > { %v787_v25 = vpop.f32.mrf.mxu2 }
 0x157   : > { %v810_v27 = vpop.f32.mrf.mxu2 }
 0x158   : > { %v811_v28 = vadd.f32 %v810_v27, %v787_v25 }
 0x15a   : > { %v817_v29 = vadd.f32 %v1322_v26, %v811_v28 }
 0x15c   : > { %v818_v30 = vmax.f32 %v817_v29, 0.0 }
 0x15e   : > { %1243 = vmatmul.msk.f32.vlgmr.msrb.gmra.mxu2 %vm766_vm4, %v818_v30  ;;  %1245 = vmatmul.msk.f32.vlgmr.msrb.gmra.mxu0 %vm766_vm4, %v818_v30  ;;  %821 = vst.msk [vmem:[%s2079_s16] sm:$0xff] %vm766_vm4, %v818_v30  ;;  %s1340_s16 = scalar_lea.hbm %s1339_s18, 8 }
 0x15f   : > { %1246 = vmatmul.msk.f32.vlgmr.msrb.gmra.mxu1 %vm766_vm4, %v818_v30  ;;  %p1341_p11 = scmp.ne.s32.totalorder %s1339_s18, %s1340_s16  ;;  %p1346_p1 = scmp.lt.s32.totalorder %s1344_s21, %s1340_s16 }
 0x161   : > { %p1342_p12 = pnand %p1341_p11, %p1638_p5  ;;  %p1347_p2 = por %p1346_p1, %p1345_p0 }
 0x163   : > { %p1343_p13 = pneg %p1342_p12 }
 0x165   : > { %p1348_p3 = pnand %p1347_p2, %p1343_p13 }
 0x166   : > { %1244 = vmatmul.msk.f32.vlgmr.msra.gmra.mxu2 %vm766_vm4, %v818_v30 }
 0x167   : > { %1351 = shalt.err (!%p1348_p3)
}
 0x168   : > { %1262 = dma.vmem_to_hbm [thread:$0]  (%p1638_p5), %s985_s0, 128, %s987_s20, %s1933_s30  }
 0x169   : > { %s968_s24 = scalar_lea.hbm %s2064_s13, %s1922_s22  ;;  %s2104_s17 = scalar_lea.vmem [#allocation2], %s1850_s19 }
 0x16a   : > { %s970_s3 = sshll.u32 %s2104_s17, 4  ;;  %s972_s16 = sshll.u32 %s968_s24, 4  ;;  %s971_s3 = int_to_ptr.vmem [resolvable:$true] %s970_s3  ;;  %s973_s16 = int_to_ptr.hbm [resolvable:$true] %s972_s16 }
 0x16b   : > { %s996_s29 = scalar_lea.hbm %s2066_s15, %s1922_s22  ;;  %s938_s23 = scalar_lea.sflag [#allocation3], %s1844_s26 }
 0x16c   : > { %s1366_s4 = sshra.s32 %s973_s16, 4  ;;  %s1372_s27 = scalar_lea.hbm %s2064_s13, 16  ;;  %s1367_s4 = int_to_ptr.hbm [resolvable:$true] %s1366_s4 }
 0x16d   : > { %s1368_s5 = scalar_lea.hbm %s1367_s4, 8  ;;  %p1373_p9 = scmp.lt.s32.totalorder %s1367_s4, %s2064_s13 }
 0x16e   : > { %p1369_p4 = scmp.ne.s32.totalorder %s1367_s4, %s1368_s5  ;;  %p1374_p10 = scmp.lt.s32.totalorder %s1372_s27, %s1368_s5 }
 0x170   : > { %p1370_p7 = pnand %p1369_p4, %p1638_p5  ;;  %p1375_p11 = por %p1374_p10, %p1373_p9 }
 0x172   : > { %p1371_p8 = pneg %p1370_p7 }
 0x174   : > { %p1376_p12 = pnand %p1375_p11, %p1371_p8 }
 0x176   : > { %1379 = shalt.err (!%p1376_p12)
}
 0x177   : > { %1261 = dma.vmem_to_hbm [thread:$0]  (%p1638_p5), %s971_s3, 128, %s973_s16, %s938_s23  }
 0x178   : > { %s2105_s24 = scalar_lea.vmem [#allocation6], %s1850_s19  ;;  %s1000_s21 = sshll.u32 %s996_s29, 4  ;;  %s1001_s21 = int_to_ptr.hbm [resolvable:$true] %s1000_s21 }
 0x179   : > { %s998_s18 = sshll.u32 %s2105_s24, 4  ;;  %s1394_s0 = sshra.s32 %s1001_s21, 4  ;;  %s999_s18 = int_to_ptr.vmem [resolvable:$true] %s998_s18  ;;  %s1395_s0 = int_to_ptr.hbm [resolvable:$true] %s1394_s0 }
 0x17a   : > { %s1396_s20 = scalar_lea.hbm %s1395_s0, 8  ;;  %s1400_s27 = scalar_lea.hbm %s2066_s15, 16 }
 0x17b   : > { %p1397_p13 = scmp.ne.s32.totalorder %s1395_s0, %s1396_s20  ;;  %p1401_p2 = scmp.lt.s32.totalorder %s1395_s0, %s2066_s15 }
 0x17c   : > { %p1402_p3 = scmp.lt.s32.totalorder %s1400_s27, %s1396_s20 }
 0x17d   : > { %p1398_p0 = pnand %p1397_p13, %p1638_p5 }
 0x17e   : > { %p1403_p4 = por %p1402_p3, %p1401_p2 }
 0x17f   : > { %p1399_p1 = pneg %p1398_p0 }
 0x181   : > { %p1404_p7 = pnand %p1403_p4, %p1399_p1 }
 0x183   : > { %1407 = shalt.err (!%p1404_p7)
}
 0x184   : > { %1263 = dma.vmem_to_hbm [thread:$0]  (%p1638_p5), %s999_s18, 128, %s1001_s21, %s1933_s30   ;;  %v834_v31 = vld [vmem:[%s2061_s10] sm:$0x7] }
 0x185   : > { %s1258_s16 = smul.u32 24, %s1844_s26  ;;  %v838_v32 = vperm.slane %v834_v31, 2  ;;  %v1323_v33 = vld [vmem:[%s2063_s12] ss:$0 sm:$0xff]  ;;  %v836_v38 = vperm.slane %v834_v31, 0  ;;  %s589_s30 = scalar_lea.vmem [#allocation9], %s1850_s19 }
 0x186   : > { %s1260_s18 = smul.u32 24, %s1619_s28  ;;  %s2106_s20 = sld [smem:[#allocation25_spill]]  ;;  %v837_v41 = vperm.slane %v834_v31, 1 }
 0x187   : > { %s582_s0 = scalar_lea.vmem [#allocation7], %s1258_s16  ;;  %s2107_s2 = sld [smem:[#allocation26_spill]] }
 0x188   : > { %s1013_s23 = sshll.u32 %s582_s0, 4  ;;  %s1998_s19 = sshll.u32 %s589_s30, 4  ;;  %s1014_s23 = int_to_ptr.vmem [resolvable:$true] %s1013_s23  ;;  %s1028_s19 = int_to_ptr.vmem [resolvable:$true] %s1998_s19 }
 0x189   : > { %s2108_s29 = sand.u32 1, %s1619_s28  }
 0x18a   : > { %s953_s24 = scalar_lea.sflag [#allocation8], %s2108_s29 }
 0x18c   : > { %s1011_s4 = scalar_lea.hbm %s2106_s20, %s1260_s18  ;;  %s1428_s21 = scalar_lea.hbm %s2106_s20, 48 }
 0x18d   : > { %s1025_s17 = scalar_lea.hbm %s2107_s2, %s1922_s22  ;;  %s1015_s3 = sshll.u32 %s1011_s4, 4  ;;  %s1016_s3 = int_to_ptr.hbm [resolvable:$true] %s1015_s3 }
 0x18e   : > { %s2000_s16 = sshll.u32 %s1025_s17, 4  ;;  %s1422_s22 = sshra.s32 %s1016_s3, 4  ;;  %s1030_s16 = int_to_ptr.hbm [resolvable:$true] %s2000_s16  ;;  %s1423_s22 = int_to_ptr.hbm [resolvable:$true] %s1422_s22 }
 0x18f   : > { %s1424_s18 = scalar_lea.hbm %s1423_s22, 24  ;;  %p1429_p11 = scmp.lt.s32.totalorder %s1423_s22, %s2106_s20 }
 0x190   : > { %p1425_p8 = scmp.ne.s32.totalorder %s1423_s22, %s1424_s18  ;;  %p1430_p12 = scmp.lt.s32.totalorder %s1428_s21, %s1424_s18 }
 0x192   : > { %p1426_p9 = pnand %p1425_p8, %p1638_p5  ;;  %p1431_p13 = por %p1430_p12, %p1429_p11 }
 0x194   : > { %p1427_p10 = pneg %p1426_p9 }
 0x196   : > { %p1432_p0 = pnand %p1431_p13, %p1427_p10 }
 0x1db   : > { %v902_v34 = vpop.f32.mrf.mxu0 }
 0x1dc   : > { %v903_v35 = vadd.f32 %v902_v34, %v838_v32  ;;  %v933_v36 = vpop.f32.mrf.mxu1 }
 0x1dd   : > { %v934_v37 = vadd.f32 %v1323_v33, %v933_v36 }
 0x1de   : > { %907 = vst.msk [vmem:[%s582_s0 + $0x10] sm:$0xff] %vm640_vm2, %v903_v35 }
 0x1df   : > { %936 = vst.msk [vmem:[%s589_s30] sm:$0xff] %vm729_vm3, %v934_v37 }
 0x1e1   : > { %v862_v39 = vpop.f32.mrf.mxu2 }
 0x1e2   : > { %v863_v40 = vadd.f32 %v862_v39, %v836_v38 }
 0x1e4   : > { %905 = vst [vmem:[%s582_s0] sm:$0xff] %v863_v40 }
 0x1e9   : > { %v882_v42 = vpop.f32.mrf.mxu2 }
 0x1ea   : > { %v883_v43 = vadd.f32 %v882_v42, %v837_v41 }
 0x1ec   : > { %906 = vst [vmem:[%s582_s0 + $0x8] sm:$0xff] %v883_v43 }
 0x1ed   : > { %1435 = shalt.err (!%p1432_p0)
}
 0x1ee   : > { %1264 = dma.vmem_to_hbm [thread:$0]  (%p1638_p5), %s1014_s23, 384, %s1016_s3, %s953_s24  }
 0x1ef   : > { %s1450_s28 = sshra.s32 %s1030_s16, 4  ;;  %s1456_s29 = scalar_lea.hbm %s2107_s2, 16  ;;  %s1451_s28 = int_to_ptr.hbm [resolvable:$true] %s1450_s28 }
 0x1f0   : > { %s1452_s0 = scalar_lea.hbm %s1451_s28, 8  ;;  %p1457_p4 = scmp.lt.s32.totalorder %s1451_s28, %s2107_s2 }
 0x1f1   : > { %p1453_p1 = scmp.ne.s32.totalorder %s1451_s28, %s1452_s0  ;;  %p1458_p7 = scmp.lt.s32.totalorder %s1456_s29, %s1452_s0 }
 0x1f3   : > { %p1454_p2 = pnand %p1453_p1, %p1638_p5  ;;  %p1459_p8 = por %p1458_p7, %p1457_p4 }
 0x1f5   : > { %p1455_p3 = pneg %p1454_p2 }
 0x1f7   : > { %p1460_p9 = pnand %p1459_p8, %p1455_p3 }
 0x1f9   : > { %1463 = shalt.err (!%p1460_p9)
}
 0x1fa   : > { %1265 = dma.vmem_to_hbm [thread:$0]  (%p1638_p5), %s1028_s19, 128, %s1030_s16, %s953_s24  }
 0x1fb PF: > { %s2109_s23 = sld [smem:[#allocation15_spill]] }
 0x1fc   : > { %s2110_s3 = sld [smem:[#allocation13_spill]] }
 0x201   : > { %p1287_p10 = scmp.ge.s32.totalorder %s2109_s23, 2 }
 0x202   : > { %s1041_s26 = sand.u32 1, %s2110_s3  }
 0x203   : > { %p1272_p11 = pnand %p1287_p10, %p1642_p6  ;;  %s1042_s21 = scalar_lea.sflag [#allocation3], %s1041_s26 }
 0x205   : > { %p1273_p12 = pneg %p1272_p11 }
 0x207   : > { %1481 = dma.done.wait (%p1273_p12), %s1042_s21, 128  }
 0x208   : > { %1483 = vsyncadd (%p1273_p12), %s1042_s21, 4294967168  ;;  %s2112_s4 = sadd.s32 4294967294, %s2109_s23  }
 0x209   : > { %s1051_s1 = sand.u32 1, %s2112_s4  }
 0x20a   : > { %s1052_s5 = scalar_lea.sflag [#allocation5], %s1051_s1 }
 0x20b   : > { %1485 = dma.done.wait (%p1273_p12), %s1052_s5, 256  }
 0x20c   : > { %1487 = vsyncadd (%p1273_p12), %s1052_s5, 4294967040  ;;  %s1072_s28 = scalar_lea.sflag [#allocation8], %s1051_s1 }
 0x20d   : > { %1489 = dma.done.wait (%p1273_p12), %s1072_s28, 512  }
 0x20e   : > { %1491 = vsyncadd (%p1273_p12), %s1072_s28, 4294966784  ;;  %s2113_s27 = sld [smem:[#allocation16_spill]]  ;;  %s2116_s24 = smov %s1498_s25 }
 0x20f   : > { %s2114_s19 = sld [smem:[#allocation14_spill]] }
 0x210   : > { %s2115_s26 = sld [smem:[#allocation17_spill]] }
 0x214   : > { %p34_p5 = scmp.ge.s32.totalorder %s2113_s27, 4  }
 0x215   : > { %s2117_s25 = smov %s2114_s19 }
 0x216   :  { %36 = sbr.rel (!%p34_p5) target bundleno = 16 (0x10), region = 174 }
 0x21b   :  { %1088 = vsyncpa [#allocation3], 1 }
 0x21c   :  { %1090 = vsyncpa [#allocation3 + $0x1], 1 }
 0x21d   :  { %1091 = vsyncpa [#allocation5], 1 }
 0x21e   :  { %1093 = vsyncpa [#allocation5 + $0x1], 1 }
 0x21f   :  { %1094 = vsyncpa [#allocation8], 1 }
 0x220   :  { %1096 = vsyncpa [#allocation8 + $0x1], 1 }

</bundles_post_ra>
